<compile_context>
chip_gen: v7x
topology: tpu7x:2x2x1
jax: 0.10.0
libtpu: 0.0.40
codegen_flags: <defaults>
</compile_context>

<pallas_src>
from math import sqrt

import jax
import jax.numpy as jnp
from jax import lax
from jax.experimental import pallas as pl
from jax.experimental.pallas import tpu as pltpu

W_DIM = 256          # d_latent
OUT_LANES = 128      # lane-dense output slab width


# --------------------------------------------------------------------------- #
# Pallas kernel: gradient-norm statistics + EMA / loss epilogue                #
# --------------------------------------------------------------------------- #
def _d_tile(d):
    """Largest latent-dim tile (multiple of 128) that still gives >= 2 steps."""
    for t in (1024, 512, 256, 128):
        if d % t == 0 and d // t >= 2:
            return t
    return d


def _plp_stats_kernel(state_ref, g_ref, o_ref, ssq_ref):
    """state_ref: SMEM (4,) f32 [steps, exp_sum_a, beta, beta**steps];
    g_ref:   VMEM [L, B, TD] f32 gradient tile (grid over the latent dim);
    o_ref:   VMEM (1, 128) f32 lane-dense result slab,
             lanes 0..3 = [loss, new_exp_sum_a, new_steps, new beta**steps];
    ssq_ref: VMEM (L, B) f32 running sum-of-squares accumulator."""
    d = pl.program_id(0)

    @pl.when(d == 0)
    def _():
        ssq_ref[...] = jnp.zeros_like(ssq_ref)

    g = g_ref[...]                                   # [L, B, TD] f32
    ssq_ref[...] += jnp.sum(g * g, axis=2)           # [L, B]

    @pl.when(d == pl.num_programs(0) - 1)
    def _():
        def vec(v):
            return jnp.full((1, 1), v, jnp.float32)

        steps = vec(state_ref[0])
        esa = vec(state_ref[1])
        beta = vec(state_ref[2])
        bpow = vec(state_ref[3])                     # beta**steps

        # norm = sqrt(mean_B(sum_D(grad**2)))  per generator layer -> [L, 1]
        norm = jnp.sqrt(jnp.mean(ssq_ref[...], axis=1, keepdims=True))
        mean_norm = jnp.mean(norm, axis=0, keepdims=True)            # [1, 1]

        denom = 1.0 - bpow
        a = esa / jnp.where(denom == 0.0, 1.0, denom)
        mse = jnp.mean((norm - a) ** 2, axis=0, keepdims=True)
        loss = jnp.where(steps > 0.0, mse, jnp.zeros_like(mse))

        new_esa = beta * esa + (1.0 - beta) * mean_norm
        new_steps = steps + 1.0
        new_bpow = bpow * beta

        lane = lax.broadcasted_iota(jnp.int32, (1, OUT_LANES), 1)
        o_ref[...] = (loss * (lane == 0).astype(jnp.float32)
                      + new_esa * (lane == 1).astype(jnp.float32)
                      + new_steps * (lane == 2).astype(jnp.float32)
                      + new_bpow * (lane == 3).astype(jnp.float32))


def plp_stats(grads, state):
    """grads: [L, B, D] f32 = d(output)/d(w); state: (4,) f32
    [steps, exp_sum_a, beta, beta**steps].  Returns (loss, new_state)."""
    L, B, D = grads.shape
    td = _d_tile(D)
    assert D % td == 0
    out = pl.pallas_call(
        _plp_stats_kernel,
        grid=(D // td,),
        in_specs=[
            pl.BlockSpec(memory_space=pltpu.MemorySpace.SMEM),
            pl.BlockSpec((L, B, td), lambda d: (0, 0, d)),
        ],
        out_specs=pl.BlockSpec((1, OUT_LANES), lambda d: (0, 0)),
        out_shape=jax.ShapeDtypeStruct((1, OUT_LANES), jnp.float32),
        scratch_shapes=[pltpu.VMEM((L, B), jnp.float32)],
        compiler_params=pltpu.CompilerParams(
            dimension_semantics=("arbitrary",)),
    )(state, grads)
    loss = out[0, 0]
    new_state = jnp.stack([out[0, 2], out[0, 1], state[2], out[0, 3]])
    return loss, new_state


# --------------------------------------------------------------------------- #
# PathLengthPenalty forward (functional JAX version of the torch module)       #
# --------------------------------------------------------------------------- #
def path_length_penalty(w, gen_fn, state, key):
    """w: [L, B, D] latent; gen_fn: differentiable pure-JAX generator w -> x
    ([B, C, H, W]); state: (4,) f32 buffers; key: PRNG key for y.
    Returns (loss, new_state, grads)."""
    x = gen_fn(w)
    image_size = x.shape[2] * x.shape[3]
    y = jax.random.normal(key, x.shape, x.dtype)

    # TODO(synk): torch.autograd.grad has no Pallas equivalent (Pallas kernels
    # define no VJP); the gradient of output w.r.t. w is taken with jax.grad
    # through the pure-JAX generator.  Only the norm/EMA/loss statistics run
    # in the Pallas kernel.
    def output_fn(w_):
        return jnp.sum(gen_fn(w_) * y) / sqrt(image_size)

    grads = jax.grad(output_fn)(w)
    loss, new_state = plp_stats(grads, state)
    return loss, new_state, grads


# --------------------------------------------------------------------------- #
# Pure-JAX reference of the statistics (for tolerance checks)                  #
# --------------------------------------------------------------------------- #
def _ref_path_length_penalty(grads, state):
    steps, esa, beta = state[0], state[1], state[2]
    norm = jnp.sqrt(jnp.mean(jnp.sum(grads ** 2, axis=2), axis=1))
    denom = 1.0 - beta ** steps
    a = esa / jnp.where(denom == 0.0, 1.0, denom)
    loss = jnp.where(steps > 0.0, jnp.mean((norm - a) ** 2), 0.0)
    mean = jnp.mean(norm)
    new_state = jnp.stack([steps + 1.0, beta * esa + (1.0 - beta) * mean, beta,
                           beta ** (steps + 1.0)])
    return loss, new_state


# --------------------------------------------------------------------------- #
if __name__ == "__main__":
    L, B, D = 2, 2, W_DIM           # [n_gen_blocks, batch, d_latent]
    C, H, W = 3, 16, 16
    beta = 0.99

    key = jax.random.PRNGKey(0)
    kw, kg, ky1, ky2 = jax.random.split(key, 4)
    w = jax.random.normal(kw, (L, B, D), jnp.float32)
    gmat = jax.random.normal(kg, (L, D, C * H * W), jnp.float32) / sqrt(D)

    def gen_fn(w_):
        """Differentiable pure-JAX generator stand-in: w -> image [B,C,H,W]."""
        img = jnp.einsum("lbd,ldo->bo", w_, gmat)
        return jnp.tanh(img).reshape(B, C, H, W)

    # state buffers: [steps, exp_sum_a, beta, beta**steps]
    state = jnp.array([0.0, 0.0, beta, 1.0], jnp.float32)
    ref_state = state

    fwd = jax.jit(lambda w_, st, k: path_length_penalty(w_, gen_fn, st, k))

    for step_key in (ky1, ky2):                      # step 0 (loss==0), step 1
        loss, state, grads = fwd(w, state, step_key)
        jax.block_until_ready((loss, state, grads))
        ref_loss, ref_state = _ref_path_length_penalty(grads, ref_state)
        assert jnp.allclose(loss, ref_loss, rtol=1e-4, atol=1e-5), (loss, ref_loss)
        assert jnp.allclose(state[:2], ref_state[:2], rtol=1e-4, atol=1e-5)
        assert jnp.allclose(state[3], ref_state[3], rtol=1e-4, atol=1e-5)

    print("KERNEL_OK")
</pallas_src>

<mosaic_0001>
module attributes {stable_mosaic.version = 11 : i64} {
  func.func @_plp_stats_kernel(%arg0: i32, %arg1: memref<4xf32, #tpu.memory_space<smem>>, %arg2: memref<2x2x128xf32, #tpu.memory_space<vmem>>, %arg3: memref<1x128xf32, #tpu.memory_space<vmem>>, %arg4: memref<2x2xf32, #tpu.memory_space<vmem>>) attributes {dimension_semantics = [#tpu.dimension_semantics<arbitrary>], iteration_bounds = array<i64: 2>, scalar_prefetch = 0 : i64, scratch_operands = 1 : i64, tpu.core_type = #tpu.core_type<tc>, window_params = [{transform_indices = @transform_0, window_bounds = array<i64: 4>}, {transform_indices = @transform_1, window_bounds = array<i64: 2, 2, 128>}, {pipeline_mode = #tpu.pipeline_mode<synchronous>, transform_indices = @transform_2, window_bounds = array<i64: 1, 128>}]} {
    %c0_i32 = arith.constant 0 : i32
    %0 = arith.cmpi eq, %arg0, %c0_i32 : i32
    %1 = arith.extui %0 : i1 to i32
    %c0_i32_0 = arith.constant 0 : i32
    %2 = arith.cmpi ne, %1, %c0_i32_0 : i32
    scf.if %2 {
      %cst_8 = arith.constant 0.000000e+00 : f32
      %12 = vector.broadcast %cst_8 : f32 to vector<2x2xf32>
      %c0_9 = arith.constant 0 : index
      %c0_10 = arith.constant 0 : index
      %13 = vector.load %arg4[%c0_9, %c0_10] : memref<2x2xf32, #tpu.memory_space<vmem>>, vector<2x2xf32>
      tpu.vector_store %arg4[%c0_9, %c0_10], %12 {strides = array<i32>} : memref<2x2xf32, #tpu.memory_space<vmem>>, vector<2x2xf32>,
    } else {
    }
    %c0 = arith.constant 0 : index
    %c0_1 = arith.constant 0 : index
    %c0_2 = arith.constant 0 : index
    %3 = vector.load %arg2[%c0, %c0_1, %c0_2] : memref<2x2x128xf32, #tpu.memory_space<vmem>>, vector<2x2x128xf32>
    %c0_3 = arith.constant 0 : index
    %c0_4 = arith.constant 0 : index
    %4 = vector.load %arg4[%c0_3, %c0_4] : memref<2x2xf32, #tpu.memory_space<vmem>>, vector<2x2xf32>
    %5 = arith.mulf %3, %3 : vector<2x2x128xf32>
    %cst = arith.constant dense<0.000000e+00> : vector<2x2xf32>
    %6 = vector.multi_reduction <add>, %5, %cst [2] : vector<2x2x128xf32> to vector<2x2xf32>
    %7 = arith.addf %4, %6 : vector<2x2xf32>
    %c0_5 = arith.constant 0 : index
    %c0_6 = arith.constant 0 : index
    %8 = vector.load %arg4[%c0_5, %c0_6] : memref<2x2xf32, #tpu.memory_space<vmem>>, vector<2x2xf32>
    tpu.vector_store %arg4[%c0_5, %c0_6], %7 {strides = array<i32>} : memref<2x2xf32, #tpu.memory_space<vmem>>, vector<2x2xf32>,
    %c1_i32 = arith.constant 1 : i32
    %9 = arith.cmpi eq, %arg0, %c1_i32 : i32
    %10 = arith.extui %9 : i1 to i32
    %c0_i32_7 = arith.constant 0 : i32
    %11 = arith.cmpi ne, %10, %c0_i32_7 : i32
    scf.if %11 {
      %c0_8 = arith.constant 0 : index
      %12 = memref.load %arg1[%c0_8] : memref<4xf32, #tpu.memory_space<smem>>
      %13 = vector.broadcast %12 : f32 to vector<1x1xf32>
      %c1 = arith.constant 1 : index
      %14 = memref.load %arg1[%c1] : memref<4xf32, #tpu.memory_space<smem>>
      %15 = vector.broadcast %14 : f32 to vector<1x1xf32>
      %c2 = arith.constant 2 : index
      %16 = memref.load %arg1[%c2] : memref<4xf32, #tpu.memory_space<smem>>
      %17 = vector.broadcast %16 : f32 to vector<1x1xf32>
      %c3 = arith.constant 3 : index
      %18 = memref.load %arg1[%c3] : memref<4xf32, #tpu.memory_space<smem>>
      %19 = vector.broadcast %18 : f32 to vector<1x1xf32>
      %c0_9 = arith.constant 0 : index
      %c0_10 = arith.constant 0 : index
      %20 = vector.load %arg4[%c0_9, %c0_10] : memref<2x2xf32, #tpu.memory_space<vmem>>, vector<2x2xf32>
      %cst_11 = arith.constant dense<0.000000e+00> : vector<2xf32>
      %21 = vector.multi_reduction <add>, %20, %cst_11 [1] : vector<2x2xf32> to vector<2xf32>
      %22 = vector.shape_cast %21 : vector<2xf32> to vector<2x1xf32>
      %cst_12 = arith.constant 2.000000e+00 : f32
      %23 = vector.broadcast %cst_12 : f32 to vector<2x1xf32>
      %24 = arith.divf %22, %23 : vector<2x1xf32>
      %25 = math.sqrt %24 : vector<2x1xf32>
      %cst_13 = arith.constant dense<0.000000e+00> : vector<1xf32>
      %26 = vector.multi_reduction <add>, %25, %cst_13 [0] : vector<2x1xf32> to vector<1xf32>
      %27 = vector.shape_cast %26 : vector<1xf32> to vector<1x1xf32>
      %cst_14 = arith.constant 2.000000e+00 : f32
      %28 = vector.broadcast %cst_14 : f32 to vector<1x1xf32>
      %29 = arith.divf %27, %28 : vector<1x1xf32>
      %cst_15 = arith.constant 1.000000e+00 : f32
      %30 = vector.broadcast %cst_15 : f32 to vector<1x1xf32>
      %31 = arith.subf %30, %19 : vector<1x1xf32>
      %cst_16 = arith.constant 0.000000e+00 : f32
      %32 = vector.broadcast %cst_16 : f32 to vector<1x1xf32>
      %33 = arith.cmpf oeq, %31, %32 : vector<1x1xf32>
      %cst_17 = arith.constant 1.000000e+00 : f32
      %34 = vector.broadcast %cst_17 : f32 to vector<1x1xf32>
      %35 = arith.select %33, %34, %31 : vector<1x1xi1>, vector<1x1xf32>
      %36 = arith.divf %15, %35 : vector<1x1xf32>
      %37 = vector.broadcast %36 : vector<1x1xf32> to vector<2x1xf32>
      %38 = arith.subf %25, %37 : vector<2x1xf32>
      %39 = arith.mulf %38, %38 : vector<2x1xf32>
      %cst_18 = arith.constant dense<0.000000e+00> : vector<1xf32>
      %40 = vector.multi_reduction <add>, %39, %cst_18 [0] : vector<2x1xf32> to vector<1xf32>
      %41 = vector.shape_cast %40 : vector<1xf32> to vector<1x1xf32>
      %cst_19 = arith.constant 2.000000e+00 : f32
      %42 = vector.broadcast %cst_19 : f32 to vector<1x1xf32>
      %43 = arith.divf %41, %42 : vector<1x1xf32>
      %cst_20 = arith.constant 0.000000e+00 : f32
      %44 = vector.broadcast %cst_20 : f32 to vector<1x1xf32>
      %45 = arith.cmpf ogt, %13, %44 : vector<1x1xf32>
      %cst_21 = arith.constant 0.000000e+00 : f32
      %46 = vector.broadcast %cst_21 : f32 to vector<1x1xf32>
      %47 = arith.select %45, %43, %46 : vector<1x1xi1>, vector<1x1xf32>
      %48 = arith.mulf %17, %15 : vector<1x1xf32>
      %cst_22 = arith.constant 1.000000e+00 : f32
      %49 = vector.broadcast %cst_22 : f32 to vector<1x1xf32>
      %50 = arith.subf %49, %17 : vector<1x1xf32>
      %51 = arith.mulf %50, %29 : vector<1x1xf32>
      %52 = arith.addf %48, %51 : vector<1x1xf32>
      %cst_23 = arith.constant 1.000000e+00 : f32
      %53 = vector.broadcast %cst_23 : f32 to vector<1x1xf32>
      %54 = arith.addf %13, %53 : vector<1x1xf32>
      %55 = arith.mulf %19, %17 : vector<1x1xf32>
      %56 = tpu.iota {dimensions = array<i32: 1>} : vector<1x128xi32>
      %c0_i32_24 = arith.constant 0 : i32
      %57 = vector.broadcast %c0_i32_24 : i32 to vector<1x128xi32>
      %58 = arith.cmpi eq, %56, %57 : vector<1x128xi32>
      %59 = arith.extui %58 : vector<1x128xi1> to vector<1x128xi32>
      %60 = arith.sitofp %59 : vector<1x128xi32> to vector<1x128xf32>
      %61 = vector.broadcast %47 : vector<1x1xf32> to vector<1x128xf32>
      %62 = arith.mulf %61, %60 : vector<1x128xf32>
      %c1_i32_25 = arith.constant 1 : i32
      %63 = vector.broadcast %c1_i32_25 : i32 to vector<1x128xi32>
      %64 = arith.cmpi eq, %56, %63 : vector<1x128xi32>
      %65 = arith.extui %64 : vector<1x128xi1> to vector<1x128xi32>
      %66 = arith.sitofp %65 : vector<1x128xi32> to vector<1x128xf32>
      %67 = vector.broadcast %52 : vector<1x1xf32> to vector<1x128xf32>
      %68 = arith.mulf %67, %66 : vector<1x128xf32>
      %69 = arith.addf %62, %68 : vector<1x128xf32>
      %c2_i32 = arith.constant 2 : i32
      %70 = vector.broadcast %c2_i32 : i32 to vector<1x128xi32>
      %71 = arith.cmpi eq, %56, %70 : vector<1x128xi32>
      %72 = arith.extui %71 : vector<1x128xi1> to vector<1x128xi32>
      %73 = arith.sitofp %72 : vector<1x128xi32> to vector<1x128xf32>
      %74 = vector.broadcast %54 : vector<1x1xf32> to vector<1x128xf32>
      %75 = arith.mulf %74, %73 : vector<1x128xf32>
      %76 = arith.addf %69, %75 : vector<1x128xf32>
      %c3_i32 = arith.constant 3 : i32
      %77 = vector.broadcast %c3_i32 : i32 to vector<1x128xi32>
      %78 = arith.cmpi eq, %56, %77 : vector<1x128xi32>
      %79 = arith.extui %78 : vector<1x128xi1> to vector<1x128xi32>
      %80 = arith.sitofp %79 : vector<1x128xi32> to vector<1x128xf32>
      %81 = vector.broadcast %55 : vector<1x1xf32> to vector<1x128xf32>
      %82 = arith.mulf %81, %80 : vector<1x128xf32>
      %83 = arith.addf %76, %82 : vector<1x128xf32>
      %c0_26 = arith.constant 0 : index
      %c0_27 = arith.constant 0 : index
      %84 = vector.load %arg3[%c0_26, %c0_27] : memref<1x128xf32, #tpu.memory_space<vmem>>, vector<1x128xf32>
      tpu.vector_store %arg3[%c0_26, %c0_27], %83 {strides = array<i32>} : memref<1x128xf32, #tpu.memory_space<vmem>>, vector<1x128xf32>,
    } else {
    }
    return
  }
  func.func @transform_0(%arg0: i32) -> i32 {
    %c0_i32 = arith.constant 0 : i32
    %c0_i32_0 = arith.constant 0 : i32
    return %c0_i32 : i32
  }
  func.func @transform_1(%arg0: i32) -> (i32, i32, i32) {
    %c0_i32 = arith.constant 0 : i32
    %c0_i32_0 = arith.constant 0 : i32
    %c0_i32_1 = arith.constant 0 : i32
    return %c0_i32, %c0_i32_0, %arg0 : i32, i32, i32
  }
  func.func @transform_2(%arg0: i32) -> (i32, i32) {
    %c0_i32 = arith.constant 0 : i32
    %c0_i32_0 = arith.constant 0 : i32
    %c0_i32_1 = arith.constant 0 : i32
    return %c0_i32, %c0_i32_0 : i32, i32
  }
}

</mosaic_0001>

<bundles_post_ra>
// kernel: _lambda_.1
= control target key start
LH: loop header
LB: loop body
LE: loop exit
PB: predicated region body
PF: predicated region fallthrough
CT: control target
= control target key end

     0   :  { %7 = vsyncpa [#allocation4], 0  ;;  %s460_s9 = smov 0   ;;  %s462_s10 = smov 0   ;;  %s557_s0 = inlined_call_operand.vmem [shape: f32[4], index: 0, kind: input, shape index: {}]   ;;  %s558_s1 = inlined_call_operand.vmem [shape: f32[2,2,256], index: 1, kind: input, shape index: {}]   ;;  %s559_s2 = inlined_call_operand.vmem [shape: f32[1,128], index: 2, kind: output, shape index: {}]  }
   0x1   :  { %s464_s11 = smov 0  }
   0x2 LB: > { %s476_s12 = sadd.s32 4294967295, %s440_s11   ;;  %s479_s13 = sadd.s32 1, %s440_s11   ;;  %s440_s11 = sphi %s464_s11, %s565_s11   ;;  %s436_s10 = sphi %s462_s10, %s564_s10   ;;  %s432_s9 = sphi %s460_s9, %s563_s9  }
   0x3   : > { %s38_s14 = ssub.s32 %s440_s11, %s479_s13  ;;  %s41_s15 = sadd.s32 1, %s436_s10 }
   0x4   : > { %p39_p0 = scmp.eq.s32.totalorder %s38_s14, 0  ;;  %p48_p1 = scmp.ne.s32.totalorder %s436_s10, %s432_s9 }
   0x5   : > { %p49_p2 = scmp.eq.s32.totalorder %s440_s11, 0  ;;  %p339_p3 = scmp.ge.s32.totalorder %s440_s11, 1 }
   0x6   : > { %s489_s16 = scalar_select %p39_p0, %s436_s10, %s41_s15  }
   0x7   : > { %p491_p4 = por %p49_p2, %p48_p1  ;;  %p86_p5 = scmp.lt.s32.totalorder %s440_s11, 3 }
   0x8   : > { %p366_p7 = scmp.eq.s32.totalorder %s476_s12, 0  ;;  %s99_s21 = sshll.u32 %s557_s0, 4  ;;  %s100_s21 = int_to_ptr.vmem [resolvable:$true] %s99_s21 }
   0x9   : > { %p498_p8 = pnand %p339_p3, %p86_p5  ;;  %s399_s22 = scalar_lea.vmem %s100_s21, 16 }
   0xa   : > { %p400_p11 = scmp.ne.s32.totalorder %s100_s21, %s399_s22  ;;  %p407_p1 = scmp.lt.s32.totalorder %s100_s21, %s100_s21 }
   0xb   : > { %p362_p9 = pneg %p498_p8  ;;  %p408_p2 = scmp.lt.s32.totalorder %s399_s22, %s399_s22 }
   0xd   : > { %p363_p10 = pnand %p366_p7, %p362_p9  ;;  %p409_p3 = por %p408_p2, %p407_p1 }
   0xf   : > { %p401_p12 = pneg %p363_p10 }
  0x11   : > { %p402_p13 = pnand %p401_p12, %p400_p11 }
  0x13   : > { %p403_p0 = pneg %p402_p13 }
  0x15   : > { %p410_p5 = pnand %p409_p3, %p403_p0 }
  0x17   : > { %413 = shalt.err (!%p410_p5)
}
  0x18   : > { %s442_s23 = smov [#allocation3]   ;;  %p341_p6 = scmp.ge.s32.totalorder %s440_s11, 2 }
  0x19   : > { %365 = dma.vmem_to_smem (!%p363_p10), %s100_s21, 16, %s442_s23, [#allocation4]  }
  0x1a   : > { %106 = sbr.rel (%p341_p6) target bundleno = 40 (0x28), region = 20 }
  0x21   : > { %109 = sbr.rel (!%p491_p4) target bundleno = 40 (0x28), region = 24  ;;  %s111_s24 = sand.u32 (%p491_p4), 1, %s436_s10  }
  0x22   : > { %s343_s25 = sshll.u32 (%p491_p4), %s440_s11, 1  ;;  %s342_s26 = sshll.u32 (%p491_p4), %s111_s24, 2 }
  0x23   : > { %s115_s29 = scalar_lea.vmem (%p491_p4), %s558_s1, %s343_s25  ;;  %s113_s30 = scalar_lea.vmem (%p491_p4), [#allocation5], %s342_s26 }
  0x24   : > { %v131_v0 = vld [vmem:[%s115_s29] sm:$0x3] (%p491_p4)  ;;  %v133_v1 = vld [vmem:[%s115_s29 + $0x4] sm:$0x3] (%p491_p4) }
  0x25   : > { %132 = vst [vmem:[%s113_s30] sm:$0x3] (%p491_p4), %v131_v0  ;;  %134 = vst [vmem:[%s113_s30 + $0x2] sm:$0x3] (%p491_p4), %v133_v1 }
  0x28 PF: > { %156 = sbr.rel (%p498_p8) target bundleno = 413 (0x19d), region = 58 }
  0x2f   : > { %427 = dma.done.wait (%p366_p7), [#allocation4], 16  }
  0x30   : > { %429 = vsyncadd (%p366_p7), [#allocation4], 4294967280  ;;  %s163_s3 = sand.u32 1, %s432_s9  }
  0x31   : > { %s346_s4 = sshll.u32 %s163_s3, 2 }
  0x32   : > { %s165_s5 = scalar_lea.vmem [#allocation5], %s346_s4 }
  0x33   : > { %169 = sfence }
  0x34   : > { %p562_p4 = scmp.ne.s32.totalorder %s476_s12, 0 }
  0x35   : > { %vm184_vm0 = vcmask (!%p562_p4), 9216   ;;  %v443_v2 = vmov (!%p562_p4), 0.0  }
  0x36   : > { %183 = sbr.rel (%p562_p4) target bundleno = 61 (0x3d), region = 70  ;;  %185 = vst.msk [vmem:[#allocation2] sm:$0x3] (!%p562_p4), %vm184_vm0, %v443_v2 }
  0x3d PF: > { %v186_v3 = vld [vmem:[%s165_s5] sm:$0x3]  ;;  %vm191_vm1 = vcmask 1041408   ;;  %v187_v4 = vld [vmem:[%s165_s5 + $0x2] sm:$0x3]  ;;  %v200_v9 = vlaneseq  ;;  %vm210_vm2 = vcmask 1041409  }
  0x3e   : > { %v189_v5 = vmul.f32 %v186_v3, %v186_v3  ;;  %v190_v6 = vmul.f32 %v187_v4, %v187_v4  ;;  %v188_v16 = vld [vmem:[#allocation2] sm:$0x3]  ;;  %vm214_vm3 = vcmask 9216   ;;  %p348_p6 = scmp.ne.s32.totalorder %s476_s12, 1 }
  0x3f   : > { %v528_v10 = vand.u32 127, %v200_v9  ;;  %v203_v11 = vshrl.u32 %v200_v9, 7  ;;  %s532_s6 = sld [smem:[#allocation3 + $0x3]] (!%p348_p6)  ;;  %s535_s7 = sld [smem:[#allocation3 + $0x1]] (!%p348_p6)  ;;  %v444_v58 = vmov (!%p348_p6), 0.0  }
  0x40   : > { %v192_v7 = vsel %vm191_vm1, %v189_v5, 0.0  ;;  %v195_v8 = vsel %vm191_vm1, %v190_v6, 0.0  ;;  %s350_s8 = sld [smem:[#allocation3 + $0x2]] (!%p348_p6)  ;;  %s220_s9 = sld [smem:[#allocation3]] (!%p348_p6) }
  0x41   : > { %193 = vadd.xlane.f32.xlu0 %v192_v7  ;;  %v204_v13 = vsub.s32 %v528_v10, %v203_v11  ;;  %vm276_vm7 = vcmp.eq.s32.totalorder (!%p348_p6), %v528_v10, 1  ;;  %vm272_vm8 = vcmp.eq.s32.totalorder (!%p348_p6), %v528_v10, 0  ;;  %vm281_vm9 = vcmp.eq.s32.totalorder (!%p348_p6), %v528_v10, 2 }
  0x42   : > { %v353_v59 = vsel (!%p348_p6), %vm276_vm7, 1.0, %v444_v58  ;;  %vm286_vm11 = vcmp.eq.s32.totalorder (!%p348_p6), %v528_v10, 3  ;;  %v352_v62 = vsel (!%p348_p6), %vm272_vm8, 1.0, %v444_v58  ;;  %v354_v63 = vsel (!%p348_p6), %vm281_vm9, 1.0, %v444_v58 }
  0x43   : > { %v355_v3 = vsel (!%p348_p6), %vm286_vm11, 1.0, %v444_v58 }
  0x45   : > { %196 = vadd.xlane.f32.xlu0 %v195_v8  ;;  %v227_v22 = vstv (!%p348_p6), %s532_s6  ;;  %v223_v28 = vstv (!%p348_p6), %s535_s7 }
  0x46   : > { %v249_v23 = vsub.f32 (!%p348_p6), 1.0, %v227_v22  ;;  %v225_v45 = vstv (!%p348_p6), %s350_s8  ;;  %v221_v51 = vstv (!%p348_p6), %s220_s9 }
  0x47   : > { %v267_v50 = vsub.f32 (!%p348_p6), 1.0, %v225_v45  ;;  %v266_v52 = vmul.f32 (!%p348_p6), %v225_v45, %v223_v28  ;;  %vm264_vm10 = vcmp.gt.f32.partialorder (!%p348_p6), %v221_v51, 0.0  ;;  %v270_v57 = vadd.f32 (!%p348_p6), 1.0, %v221_v51 }
  0x48   : > { %vm250_vm4 = vcmp.eq.f32.partialorder (!%p348_p6), %v249_v23, 0.0  ;;  %v271_v0 = vmul.f32 (!%p348_p6), %v227_v22, %v225_v45 }
  0x49   : > { %v251_v24 = vsel (!%p348_p6), %vm250_vm4, 1.0, %v249_v23  ;;  %v284_v5 = vmul.f32 (!%p348_p6), %v354_v63, %v270_v57 }
  0x4a   : > { %395 = vrcp.f32 (!%p348_p6), %v251_v24  ;;  %v289_v7 = vmul.f32 (!%p348_p6), %v355_v3, %v271_v0 }
  0x54   : > { %v396_v27 = vpop.eup (!%p348_p6), %395 }
  0x55   : > { %v253_v31 = vmul.f32 (!%p348_p6), %v396_v27, %v223_v28 }
  0xce   : > { %v194_v12 = vpop.xlane.xlu0 %193 }
  0xcf   : > { %v205_v15 = vrot.slane %v194_v12, %v204_v13 }
  0xd2   : > { %v197_v14 = vpop.xlane.xlu0 %196  ;;  %219 = sbr.rel (%p348_p6) target bundleno = 413 (0x19d), region = 74 }
  0xd3   : > { %v209_v17 = vrot.slane %v197_v14, %v204_v13 }
  0xd5   : > { %v211_v18 = vsel %vm210_vm2, %v209_v17, %v205_v15 }
  0xd6   : > { %v213_v19 = vadd.f32 %v211_v18, %v188_v16 }
  0xd8   : > { %215 = vst.msk [vmem:[#allocation2] sm:$0x3] %vm214_vm3, %v213_v19 }
  0xdf   : > { %v228_v20 = vld [vmem:[#allocation2] sm:$0x3] }
  0xe0   : > { %v229_v21 = vsel %vm214_vm3, %v228_v20, 0.0 }
  0xe1   : > { %230 = vadd.xlane.f32.xlu0 %v229_v21 }
 0x16e   : > { %v231_v25 = vpop.xlane.xlu0 %230 }
 0x16f   : > { %v233_v26 = vmul.f32 0.5, %v231_v25 }
 0x171   : > { %397 = vrsqrt.f32 %v233_v26  ;;  %vm236_vm5 = vcmp.eq.f32.partialorder %v233_v26, inf  ;;  %v239_v32 = vand.u32 2147483648, %v233_v26  ;;  %vm238_vm6 = vcmp.eq.f32.partialorder %v233_v26, 0.0 }
 0x17b   : > { %v398_v29 = vpop.eup %397 }
 0x17c   : > { %v235_v30 = vmul.f32 %v398_v29, %v233_v26 }
 0x17e   : > { %v237_v33 = vsel %vm236_vm5, %v233_v26, %v235_v30 }
 0x17f   : > { %v240_v34 = vsel %vm238_vm6, %v239_v32, %v237_v33 }
 0x180   : > { %v241_v35 = vsel %vm191_vm1, %v240_v34, 0.0  ;;  %v254_v36 = vsub.f32 %v240_v34, %v253_v31 }
 0x181   : > { %v242_v37 = vrot.slane %v241_v35, 4 }
 0x182   : > { %v255_v38 = vmul.f32 %v254_v36, %v254_v36 }
 0x183   : > { %v243_v39 = vadd.f32 %v242_v37, %v241_v35 }
 0x184   : > { %v256_v40 = vsel %vm191_vm1, %v255_v38, 0.0 }
 0x185   : > { %v244_v41 = vrot.slane %v243_v39, 2  ;;  %v257_v42 = vrot.slane %v256_v40, 4 }
 0x187   : > { %v245_v43 = vadd.f32 %v244_v41, %v243_v39  ;;  %v258_v44 = vadd.f32 %v257_v42, %v256_v40 }
 0x189   : > { %v246_v46 = vrot.slane %v245_v43, 1  ;;  %v259_v47 = vrot.slane %v258_v44, 2 }
 0x18b   : > { %v247_v48 = vadd.f32 %v246_v46, %v245_v43  ;;  %v260_v49 = vadd.f32 %v259_v47, %v258_v44 }
 0x18d   : > { %v248_v53 = vmul.f32 0.5, %v247_v48  ;;  %v261_v54 = vrot.slane %v260_v49, 1 }
 0x18f   : > { %v262_v55 = vadd.f32 %v261_v54, %v260_v49  ;;  %v268_v56 = vmul.f32 %v267_v50, %v248_v53 }
 0x191   : > { %v263_v60 = vmul.f32 0.5, %v262_v55  ;;  %v269_v61 = vadd.f32 %v268_v56, %v266_v52 }
 0x193   : > { %v265_v1 = vsel %vm264_vm10, %v263_v60, 0.0  ;;  %v279_v2 = vmul.f32 %v353_v59, %v269_v61 }
 0x194   : > { %v275_v4 = vmul.f32 %v352_v62, %v265_v1 }
 0x196   : > { %v280_v6 = vadd.f32 %v279_v2, %v275_v4 }
 0x198   : > { %v285_v8 = vadd.f32 %v284_v5, %v280_v6 }
 0x19a   : > { %v290_v9 = vadd.f32 %v289_v7, %v285_v8 }
 0x19c   : > { %291 = vst [vmem:[%s559_s2] sm:$0x1] %v290_v9 }
 0x19d PF: > { %p10_p7 = scmp.ge.s32.totalorder %s479_s13, 4   ;;  %s563_s9 = smov %s436_s10 }
 0x19e   : > { %s564_s10 = smov %s489_s16  ;;  %s565_s11 = smov %s479_s13 }
 0x19f   :  { %12 = sbr.rel (!%p10_p7) target bundleno = 2 (0x2), region = 106 }
 0x1a6   :  { %303 = vsyncpa [#allocation4], 1 }
 0x1a7   :  { %305 = vsyncpa [#allocation4 + $0x1], 1 }

</bundles_post_ra>
